<compile_context>
chip_gen: v7x
topology: tpu7x:2x2x1
jax: 0.10.0
libtpu: 0.0.40
codegen_flags: <defaults>
</compile_context>

<pallas_src>
import jax
import jax.numpy as jnp
from jax import lax
from jax.experimental import pallas as pl
from jax.experimental.pallas import tpu as pltpu


# ----------------------------------------------------------------------------
# Kernel 1: LayerNorm + fused (q-proj | k-proj) linear over the relpos table.
# ----------------------------------------------------------------------------
def _relpos_proj_kernel(emb_ref, gamma_ref, beta_ref, w_ref, b_ref, out_ref):
    x = emb_ref[...]                                         # [W, dim]
    mean = jnp.mean(x, axis=-1, keepdims=True)
    var = jnp.mean((x - mean) ** 2, axis=-1, keepdims=True)
    xn = (x - mean) * lax.rsqrt(var + 1e-5)
    xn = xn * gamma_ref[...] + beta_ref[...]                 # LayerNorm affine
    # TODO(synk): pos_dropout is identity here (eval mode / p = 0).
    out_ref[...] = (jnp.dot(xn, w_ref[...], preferred_element_type=jnp.float32)
                    + b_ref[...])                            # [W, 2*dim]
# TODO(synk): for production sizes (W>=512, dim>=4096) tile kernel 1 over W
# rows with a real grid so the fused weight does not have to sit fully in VMEM.


# ----------------------------------------------------------------------------
# Toeplitz placement helper (band tiles): XLU lane rolls instead of one-hot.
# ----------------------------------------------------------------------------
def _toeplitz_gather(tile, d, rows, cols, W, L):
    """out[r, c] = tile[r, clip(d + c - r, 0, W - 1)] for a [rows, W] tile.

    Two lane rotations place the W in-band values at the right lanes
    (uniform dynamic roll by -d, then a static per-row strided roll by +r on a
    lane buffer of width L >= max(cols, W), multiple of 128).  Out-of-band
    lanes are overwritten by the clip masks, so the pad contents never matter.
    """
    assert L % 128 == 0 and L >= W and L >= cols
    if L > W:
        padded = jnp.concatenate(
            [tile, jnp.zeros((rows, L - W), dtype=tile.dtype)], axis=1)
    else:
        padded = tile
    shift = (-d) % L                                   # traced int32 in [0, L)
    rolled = pltpu.roll(padded, shift, axis=1)         # uniform lane roll by -d
    rolled = pltpu.roll(rolled, 0, axis=1,             # row r gets extra +r
                        stride=1, stride_axis=0)
    rolled = rolled[:, :cols]
    r_idx = lax.broadcasted_iota(jnp.int32, (rows, cols), 0)
    c_idx = lax.broadcasted_iota(jnp.int32, (rows, cols), 1)
    u = d + c_idx - r_idx                              # unclipped relpos index
    return jnp.where(u <= 0, tile[:, 0:1],
                     jnp.where(u >= W - 1, tile[:, W - 1:W], rolled))


# ----------------------------------------------------------------------------
# Kernel 2: per-(batch, head, k-tile, q-tile) relative-position placement.
# ----------------------------------------------------------------------------
def _make_scores_kernel(tq, tk, W, lo, hi, l_qp, l_kp):
    def kernel(qp_ref, kpf_ref, kedge_ref, lqp_ref, lpk_ref):
        ki = pl.program_id(2)
        qi = pl.program_id(3)
        n0 = qi * tq                       # first query row of this tile
        j0 = ki * tk                       # first key column of this tile
        d = j0 - n0 - lo                   # unclipped relpos index at (r=0, c=0)

        # Tile classification from the Toeplitz structure of relpos:
        all_left = (j0 + (tk - 1)) <= (n0 + lo)     # whole tile -> bucket 0
        all_right = j0 >= (n0 + (tq - 1) + hi)      # whole tile -> bucket W-1
        in_band = jnp.logical_not(jnp.logical_or(all_left, all_right))

        qp = qp_ref[0, 0]                  # [tq, W]  query . relpos_k scores
        kpf = kpf_ref[0, 0]                # [tk, W]  key . relpos_q, W-flipped
        edges = kedge_ref[0, 0]            # [2, tk]  key . relpos_q[0] / [W-1]

        def write_clipped(side):           # side 0 -> bucket 0, 1 -> bucket W-1
            q_col = qp[:, 0:1] if side == 0 else qp[:, W - 1:W]
            lqp_ref[0, 0] = jnp.broadcast_to(q_col, (tq, tk)).astype(lqp_ref.dtype)
            lpk_ref[0, 0] = jnp.broadcast_to(
                edges[side:side + 1, :], (tq, tk)).astype(lpk_ref.dtype)

        @pl.when(all_left)
        def _():
            write_clipped(0)

        @pl.when(all_right)
        def _():
            write_clipped(1)

        @pl.when(in_band)
        def _():
            # logits_query_pos[n, j] = qp[n, clip(j - n - lo, 0, W-1)]
            lqp = _toeplitz_gather(qp, d, tq, tk, W, l_qp)
            lqp_ref[0, 0] = lqp.astype(lqp_ref.dtype)
            # logits_pos_key[n, j] = kp[j, clip(j - n - lo, 0, W-1)].  In the
            # transposed frame (rows = key positions) this is the same Toeplitz
            # gather on the W-flipped table with offset d2 = n0 - j0 + hi.
            d2 = n0 - j0 + hi
            lpk_t = _toeplitz_gather(kpf, d2, tk, tq, W, l_kp)   # [tk, tq]
            lpk_ref[0, 0] = lpk_t.T.astype(lpk_ref.dtype)

    return kernel


# ----------------------------------------------------------------------------
# Glue (plain JAX)
# ----------------------------------------------------------------------------
def make_relposition(query_seq_len, key_seq_len, relpos_win):
    qpos = jnp.arange(query_seq_len)
    kpos = jnp.arange(key_seq_len)
    rel = jnp.clip(kpos[None, :] - qpos[:, None], relpos_win[0], relpos_win[1])
    return (rel - relpos_win[0]).astype(jnp.int32)


def _choose_block(full, candidates):
    for c in candidates:
        if c <= full and full % c == 0:
            return c
    return full


def _roundup(x, m):
    return ((x + m - 1) // m) * m


def deberta_positional_embeddings(q, k, params, *, relpos_win_size,
                                  relpos_shift=0, use_pos_layer_norm=True,
                                  q_block=None, k_block=None,
                                  out_dtype=jnp.float32):
    """Returns ((logits_pos_key, logits_query_pos, scale_factor),
                (relpos_q, relpos_k)) — same semantics as the torch module
       with relpos_q_k_enabled = [True, True].
       For production, pass out_dtype=jnp.bfloat16 to halve HBM write traffic
       (the kernel is write-bound once the gather is a roll)."""
    assert use_pos_layer_norm, "only the default use_pos_layer_norm=True path"
    B, Sq, H, Dh = q.shape
    Sk = k.shape[1]
    dim = H * Dh
    W = relpos_win_size

    # --- Kernel 1: LayerNorm + fused projections (single grid point) ---------
    emb = params["relpos_embeddings"]                      # [W, dim]
    gamma = params["ln_gamma"].reshape(1, dim)
    beta = params["ln_beta"].reshape(1, dim)
    w_fused_t = jnp.concatenate([params["relpos_q_proj_w"].T,
                                 params["relpos_k_proj_w"].T], axis=1)  # [dim, 2*dim]
    b_fused = jnp.concatenate([params["relpos_q_proj_b"],
                               params["relpos_k_proj_b"]]).reshape(1, 2 * dim)

    fused = pl.pallas_call(
        _relpos_proj_kernel,
        out_shape=jax.ShapeDtypeStruct((W, 2 * dim), jnp.float32),
    )(emb, gamma, beta, w_fused_t, b_fused)

    relpos_q = fused[:, :dim].reshape(W, H, Dh)
    relpos_k = fused[:, dim:].reshape(W, H, Dh)

    # --- Hoisted score precompute (XLA batched matmuls, done once) -----------
    # qp[b,h,n,w]  = q . relpos_k ;  kpf[b,h,j,m] = k . relpos_q[W-1-m]  (flipped
    # along W so the band gather along the key axis becomes a forward roll).
    qp = jnp.einsum("bnhx,whx->bhnw", q, relpos_k)                  # [B,H,Sq,W]
    kpf = jnp.einsum("bnhx,whx->bhnw", k, relpos_q[::-1])           # [B,H,Sk,W]
    # Edge rows for fully-clipped tiles: bucket 0 and bucket W-1 key scores,
    # laid out with Sk on lanes so clipped tiles are pure sublane broadcasts.
    kp_edges = jnp.stack([kpf[..., W - 1], kpf[..., 0]], axis=2)    # [B,H,2,Sk]

    # --- Kernel 2: Toeplitz placement -----------------------------------------
    lo = -W + 1 + relpos_shift
    hi = relpos_shift

    tq = q_block if q_block is not None else _choose_block(
        Sq, (256, 128, 64, 32, 16, 8))
    tk = k_block if k_block is not None else _choose_block(Sk, (512, 256, 128))
    assert Sq % tq == 0 and Sk % tk == 0
    assert tq == Sq or tq % 8 == 0, "q tile must be a multiple of 8 (sublanes)"
    assert tk == Sk or tk % 128 == 0, "k tile must be a multiple of 128 (lanes)"
    if out_dtype == jnp.bfloat16:
        assert tq == Sq or tq % 16 == 0, "bf16 outputs need 16-sublane q tiles"

    l_qp = _roundup(max(tk, W), 128)      # lane width of the lqp roll buffer
    l_kp = _roundup(max(tq, W), 128)      # lane width of the lpk roll buffer

    kernel = _make_scores_kernel(tq, tk, W, lo, hi, l_qp, l_kp)

    lqp, lpk = pl.pallas_call(
        kernel,
        out_shape=(jax.ShapeDtypeStruct((B, H, Sq, Sk), out_dtype),
                   jax.ShapeDtypeStruct((B, H, Sq, Sk), out_dtype)),
        grid_spec=pltpu.PrefetchScalarGridSpec(
            num_scalar_prefetch=0,
            # qi innermost: the kpf tile (index independent of qi) stays
            # resident across the whole q sweep and is not re-DMA'd.
            grid=(B, H, Sk // tk, Sq // tq),
            in_specs=[
                pl.BlockSpec((1, 1, tq, W), lambda b, h, ki, qi: (b, h, qi, 0)),
                pl.BlockSpec((1, 1, tk, W), lambda b, h, ki, qi: (b, h, ki, 0)),
                pl.BlockSpec((1, 1, 2, tk), lambda b, h, ki, qi: (b, h, 0, ki)),
            ],
            out_specs=[
                pl.BlockSpec((1, 1, tq, tk), lambda b, h, ki, qi: (b, h, qi, ki)),
                pl.BlockSpec((1, 1, tq, tk), lambda b, h, ki, qi: (b, h, qi, ki)),
            ],
        ),
        compiler_params=pltpu.CompilerParams(
            dimension_semantics=("parallel", "parallel", "parallel", "arbitrary"),
            vmem_limit_bytes=48 * 1024 * 1024),   # safe on v7x (64 MiB VMEM)
    )(qp, kpf, kp_edges)

    scale_factor = 1 + 1 + 1   # both q and k relative positions enabled
    return (lpk, lqp, scale_factor), (relpos_q, relpos_k)


# ----------------------------------------------------------------------------
# Demo + pure-JAX reference check
# ----------------------------------------------------------------------------
if __name__ == "__main__":
    # Shapes chosen so the grid has multiple q/k tiles and all three tile
    # classes (left-clipped, band, right-clipped) are exercised.
    B, S, H, Dh = 2, 384, 4, 8
    dim = H * Dh          # 32
    W = 8                 # relpos_win_size
    shift = 0

    key = jax.random.PRNGKey(0)
    ks = jax.random.split(key, 8)
    q = jax.random.normal(ks[0], (B, S, H, Dh), jnp.float32)
    k = jax.random.normal(ks[1], (B, S, H, Dh), jnp.float32)
    params = {
        "relpos_embeddings": jax.random.normal(ks[2], (W, dim), jnp.float32),
        "ln_gamma": 1.0 + 0.1 * jax.random.normal(ks[3], (dim,), jnp.float32),
        "ln_beta": 0.05 * jax.random.normal(ks[4], (dim,), jnp.float32),
        "relpos_q_proj_w": jax.random.normal(ks[5], (dim, dim), jnp.float32) / jnp.sqrt(dim),
        "relpos_q_proj_b": 0.01 * jax.random.normal(ks[6], (dim,), jnp.float32),
        "relpos_k_proj_w": jax.random.normal(ks[7], (dim, dim), jnp.float32) / jnp.sqrt(dim),
        "relpos_k_proj_b": jnp.zeros((dim,), jnp.float32),
    }

    (lpk, lqp, scale), (relpos_q, relpos_k) = deberta_positional_embeddings(
        q, k, params, relpos_win_size=W, relpos_shift=shift,
        q_block=128, k_block=128)
    jax.block_until_ready((lpk, lqp, relpos_q, relpos_k))

    # ---- pure-JAX reference (mirrors the torch forward) ----
    emb = params["relpos_embeddings"]
    mean = emb.mean(-1, keepdims=True)
    var = ((emb - mean) ** 2).mean(-1, keepdims=True)
    e = (emb - mean) / jnp.sqrt(var + 1e-5) * params["ln_gamma"] + params["ln_beta"]
    rq_expect = (e @ params["relpos_q_proj_w"].T + params["relpos_q_proj_b"]).reshape(W, H, Dh)
    rk_expect = (e @ params["relpos_k_proj_w"].T + params["relpos_k_proj_b"]).reshape(W, H, Dh)
    relpos = make_relposition(S, S, (-W + 1 + shift, shift))
    rel_full = jnp.broadcast_to(relpos[None, None], (B, H, S, S))
    qps = jnp.einsum("bnhx,khx->bhnk", q, rk_expect)
    lqp_expect = jnp.take_along_axis(qps, rel_full, axis=3)
    kps = jnp.einsum("bnhx,khx->bhkn", k, rq_expect)
    lpk_expect = jnp.take_along_axis(kps, rel_full, axis=2)

    assert scale == 3
    assert jnp.allclose(relpos_q, rq_expect, atol=2e-3, rtol=2e-3)
    assert jnp.allclose(relpos_k, rk_expect, atol=2e-3, rtol=2e-3)
    assert jnp.allclose(lqp, lqp_expect, atol=2e-3, rtol=2e-3)
    assert jnp.allclose(lpk, lpk_expect, atol=2e-3, rtol=2e-3)

    print("KERNEL_OK")
</pallas_src>

<mosaic_0001>
module attributes {stable_mosaic.version = 11 : i64} {
  func.func @_relpos_proj_kernel(%arg0: memref<8x32xf32, #tpu.memory_space<vmem>>, %arg1: memref<1x32xf32, #tpu.memory_space<vmem>>, %arg2: memref<1x32xf32, #tpu.memory_space<vmem>>, %arg3: memref<32x64xf32, #tpu.memory_space<vmem>>, %arg4: memref<1x64xf32, #tpu.memory_space<vmem>>, %arg5: memref<8x64xf32, #tpu.memory_space<vmem>>) attributes {dimension_semantics = [], scalar_prefetch = 0 : i64, scratch_operands = 0 : i64, tpu.core_type = #tpu.core_type<tc>} {
    %c0 = arith.constant 0 : index
    %c0_0 = arith.constant 0 : index
    %0 = vector.load %arg0[%c0, %c0_0] : memref<8x32xf32, #tpu.memory_space<vmem>>, vector<8x32xf32>
    %cst = arith.constant dense<0.000000e+00> : vector<8xf32>
    %1 = vector.multi_reduction <add>, %0, %cst [1] : vector<8x32xf32> to vector<8xf32>
    %2 = vector.shape_cast %1 : vector<8xf32> to vector<8x1xf32>
    %cst_1 = arith.constant 3.200000e+01 : f32
    %3 = vector.broadcast %cst_1 : f32 to vector<8x1xf32>
    %4 = arith.divf %2, %3 : vector<8x1xf32>
    %5 = vector.broadcast %4 : vector<8x1xf32> to vector<8x32xf32>
    %6 = arith.subf %0, %5 : vector<8x32xf32>
    %7 = arith.mulf %6, %6 : vector<8x32xf32>
    %cst_2 = arith.constant dense<0.000000e+00> : vector<8xf32>
    %8 = vector.multi_reduction <add>, %7, %cst_2 [1] : vector<8x32xf32> to vector<8xf32>
    %9 = vector.shape_cast %8 : vector<8xf32> to vector<8x1xf32>
    %cst_3 = arith.constant 3.200000e+01 : f32
    %10 = vector.broadcast %cst_3 : f32 to vector<8x1xf32>
    %11 = arith.divf %9, %10 : vector<8x1xf32>
    %12 = vector.broadcast %4 : vector<8x1xf32> to vector<8x32xf32>
    %13 = arith.subf %0, %12 : vector<8x32xf32>
    %cst_4 = arith.constant 9.99999974E-6 : f32
    %14 = vector.broadcast %cst_4 : f32 to vector<8x1xf32>
    %15 = arith.addf %11, %14 : vector<8x1xf32>
    %16 = math.rsqrt %15 : vector<8x1xf32>
    %17 = vector.broadcast %16 : vector<8x1xf32> to vector<8x32xf32>
    %18 = arith.mulf %13, %17 : vector<8x32xf32>
    %c0_5 = arith.constant 0 : index
    %c0_6 = arith.constant 0 : index
    %19 = vector.load %arg1[%c0_5, %c0_6] : memref<1x32xf32, #tpu.memory_space<vmem>>, vector<1x32xf32>
    %20 = vector.broadcast %19 : vector<1x32xf32> to vector<8x32xf32>
    %21 = arith.mulf %18, %20 : vector<8x32xf32>
    %c0_7 = arith.constant 0 : index
    %c0_8 = arith.constant 0 : index
    %22 = vector.load %arg2[%c0_7, %c0_8] : memref<1x32xf32, #tpu.memory_space<vmem>>, vector<1x32xf32>
    %23 = vector.broadcast %22 : vector<1x32xf32> to vector<8x32xf32>
    %24 = arith.addf %21, %23 : vector<8x32xf32>
    %c0_9 = arith.constant 0 : index
    %c0_10 = arith.constant 0 : index
    %25 = vector.load %arg3[%c0_9, %c0_10] : memref<32x64xf32, #tpu.memory_space<vmem>>, vector<32x64xf32>
    %cst_11 = arith.constant dense<0.000000e+00> : vector<8x64xf32>
    %26 = tpu.matmul %24, %25, %cst_11 {dimension_numbers = #tpu.dot_dimension_numbers<[1], [0], [0], [1], [0, 0, 1, 1], [], []>} : vector<8x32xf32>, vector<32x64xf32>, vector<8x64xf32> -> vector<8x64xf32>
    %c0_12 = arith.constant 0 : index
    %c0_13 = arith.constant 0 : index
    %27 = vector.load %arg4[%c0_12, %c0_13] : memref<1x64xf32, #tpu.memory_space<vmem>>, vector<1x64xf32>
    %28 = vector.broadcast %27 : vector<1x64xf32> to vector<8x64xf32>
    %29 = arith.addf %26, %28 : vector<8x64xf32>
    %c0_14 = arith.constant 0 : index
    %c0_15 = arith.constant 0 : index
    %30 = vector.load %arg5[%c0_14, %c0_15] : memref<8x64xf32, #tpu.memory_space<vmem>>, vector<8x64xf32>
    tpu.vector_store %arg5[%c0_14, %c0_15], %29 {strides = array<i32>} : memref<8x64xf32, #tpu.memory_space<vmem>>, vector<8x64xf32>,
    return
  }
}

</mosaic_0001>

<bundles_post_ra>
// kernel: tpu_custom_call.1
= control target key start
LH: loop header
LB: loop body
LE: loop exit
PB: predicated region body
PF: predicated region fallthrough
CT: control target
= control target key end

     0   :  { %10 = vsyncpa [#allocation3], 0  ;;  %s382_s0 = inlined_call_operand.hbm [shape: f32[8,32], index: 0, kind: input, shape index: {}]   ;;  %s383_s1 = inlined_call_operand.vmem [shape: f32[1,32], index: 1, kind: input, shape index: {}]   ;;  %s384_s2 = inlined_call_operand.vmem [shape: f32[1,32], index: 2, kind: input, shape index: {}]   ;;  %s385_s3 = inlined_call_operand.hbm [shape: f32[32,64], index: 3, kind: input, shape index: {}]   ;;  %s386_s4 = inlined_call_operand.vmem [shape: f32[1,64], index: 4, kind: input, shape index: {}]   ;;  %s387_s5 = inlined_call_operand.hbm [shape: f32[8,64], index: 5, kind: output, shape index: {}]  }
   0x1   :  { %11 = vsyncpa [#allocation6], 0 }
   0x2   :  { %12 = vsyncpa [#allocation4], 0  ;;  %s289_s18 = smov [#allocation2]   ;;  %s290_s20 = smov [#allocation5]  }
   0x3   :  { %s19_s19 = sshll.u32 %s289_s18, 4  ;;  %s32_s21 = sshll.u32 %s290_s20, 4  ;;  %s20_s19 = int_to_ptr.vmem [resolvable:$true] %s19_s19  ;;  %s327_s21 = int_to_ptr.vmem [resolvable:$true] %s32_s21 }
   0x4   :  { %s217_s24 = scalar_lea.hbm %s382_s0, 128 }
   0x5   :  { %p218_p0 = scmp.ne.s32.totalorder %s382_s0, %s217_s24  ;;  %p221_p1 = scmp.lt.u32.totalorder %s217_s24, %s382_s0 }
   0x7   :  { %p223_p2 = pnand %p221_p1, %p218_p0 }
   0x9   :  { %226 = shalt.err (!%p223_p2)
}
   0xa   :  { %s227_s29 = scalar_lea.vmem %s20_s19, 128  ;;  %p232_p4 = scmp.lt.s32.totalorder %s20_s19, %s20_s19 }
   0xb   :  { %p228_p3 = scmp.ne.s32.totalorder %s20_s19, %s227_s29  ;;  %p233_p5 = scmp.lt.s32.totalorder %s227_s29, %s227_s29 }
   0xd   :  { %p234_p6 = por %p233_p5, %p232_p4 }
   0xf   :  { %p235_p7 = pnand %p234_p6, %p228_p3 }
  0x11   :  { %238 = shalt.err (!%p235_p7)
}
  0x12   :  { %22 = dma.hbm_to_vmem [thread:$0]  %s382_s0, 128, %s20_s19, [#allocation3]  }
  0x13   :  { %s239_s9 = scalar_lea.hbm %s385_s3, 512 }
  0x14   :  { %p240_p8 = scmp.ne.s32.totalorder %s385_s3, %s239_s9  ;;  %p243_p9 = scmp.lt.u32.totalorder %s239_s9, %s385_s3 }
  0x16   :  { %p245_p10 = pnand %p243_p9, %p240_p8 }
  0x18   :  { %248 = shalt.err (!%p245_p10)
}
  0x19   :  { %s249_s14 = scalar_lea.vmem %s327_s21, 512  ;;  %p254_p12 = scmp.lt.s32.totalorder %s327_s21, %s327_s21 }
  0x1a   :  { %p250_p11 = scmp.ne.s32.totalorder %s327_s21, %s249_s14  ;;  %p255_p13 = scmp.lt.s32.totalorder %s249_s14, %s249_s14 }
  0x1c   :  { %p256_p0 = por %p255_p13, %p254_p12 }
  0x1e   :  { %p257_p1 = pnand %p256_p0, %p250_p11 }
  0x20   :  { %260 = shalt.err (!%p257_p1)
}
  0x21   :  { %s291_s0 = smov 128   ;;  %s292_s15 = smov 8  }
  0x22   :  { %38 = dma.hbm_to_vmem [thread:$0]  %s385_s3, 512, %s327_s21, [#allocation6], %s291_s0, %s291_s0, %s292_s15  }
  0x23   :  { %283 = dma.done.wait [#allocation3], 128  }
  0x24   :  { %284 = vsyncadd [#allocation3], 4294967168 }
  0x25   :  { %285 = dma.done.wait [#allocation6], 512  }
  0x26   :  { %286 = vsyncadd [#allocation6], 4294966784  ;;  %vm48_vm0 = vcmask 261120   ;;  %v47_v0 = vld [vmem:[#allocation2] sm:$0xff]  ;;  %v79_v7 = vld [vmem:[#allocation5] sm:$0xff]  ;;  %v293_v10 = vmov 0.0|0.0  }
  0x27   :  { %v49_v1 = vsel %vm48_vm0, %v47_v0, 0.0  ;;  %v80_v8 = vld [vmem:[#allocation5 + $0x8] sm:$0xff]  ;;  %v81_v9 = vld [vmem:[#allocation5 + $0x10] sm:$0xff]  ;;  %201 = vmatprep.subr.bf16.mxu0 %v293_v10  ;;  %v82_v12 = vld [vmem:[#allocation5 + $0x18] sm:$0xff]  ;;  %vm294_vm1 = vmmov 0   ;;  %v295_v13 = vmov 0.0  }
  0x28   :  { %50 = vadd.xlane.f32.xlu0 %v49_v1  ;;  %v202_v11 = vpack.c.bf16 %v80_v8, %v79_v7  ;;  %198 = vmatprep.mubr.msk.f32.mxu0 %vm294_vm1, %v295_v13  ;;  %v205_v14 = vpack.c.bf16 %v82_v12, %v81_v9  ;;  %v181_v19 = vld [vmem:[%s383_s1] ss:$0 sm:$0xff]  ;;  %s296_s23 = smov [#allocation7]   ;;  %vm163_vm2 = vcmask 523264  }
  0x29   :  { %v182_v21 = vld [vmem:[%s384_s2] ss:$0 sm:$0xff]  ;;  %s171_s24 = sshll.u32 %s296_s23, 4  ;;  %s172_s24 = int_to_ptr.vmem [resolvable:$true] %s171_s24 }
  0x2a   :  { %203 = vmatpush3.bf16.msra.mxu0 %v202_v11  ;;  %v183_v24 = vld [vmem:[%s386_s4] ss:$0 sm:$0xff]  ;;  %s261_s1 = scalar_lea.vmem %s172_s24, 128  ;;  %p266_p3 = scmp.lt.s32.totalorder %s172_s24, %s172_s24 }
  0x2b   :  { %204 = vmatprep.subr.bf16.mxu0 %v293_v10  ;;  %p262_p2 = scmp.ne.s32.totalorder %s172_s24, %s261_s1  ;;  %p267_p4 = scmp.lt.s32.totalorder %s261_s1, %s261_s1 }
  0x2d   :  { %p268_p5 = por %p267_p4, %p266_p3 }
  0x2e   :  { %206 = vmatpush3.bf16.msra.mxu0 %v205_v14 }
  0x2f   :  { %p269_p6 = pnand %p268_p5, %p262_p2 }
  0xb5   :  { %v51_v2 = vpop.xlane.xlu0 %50 }
  0xb6   :  { %v53_v3 = vmul.f32 0.03125, %v51_v2 }
  0xb8   :  { %v54_v4 = vsub.f32 %v47_v0, %v53_v3 }
  0xba   :  { %v55_v5 = vmul.f32 %v54_v4, %v54_v4 }
  0xbc   :  { %v56_v6 = vsel %vm48_vm0, %v55_v5, 0.0 }
  0xbd   :  { %57 = vadd.xlane.f32.xlu0 %v56_v6 }
 0x14a   :  { %v58_v15 = vpop.xlane.xlu0 %57 }
 0x14b   :  { %v59_v16 = vmul.f32 0.03125, %v58_v15 }
 0x14d   :  { %v60_v17 = vadd.f32 1e-05, %v59_v16 }
 0x14f   :  { %215 = vrsqrt.f32 %v60_v17 }
 0x159   :  { %v216_v18 = vpop.eup %215 }
 0x15a   :  { %v62_v20 = vmul.f32 %v216_v18, %v54_v4 }
 0x15c   :  { %v70_v22 = vmul.f32 %v181_v19, %v62_v20 }
 0x15e   :  { %v78_v23 = vadd.f32 %v182_v21, %v70_v22 }
 0x160   :  { %199 = vmatmul.mubr.msk.f32.vlgmr.msra.gmra.mrb[0].mxu0 %vm48_vm0, %v78_v23 }
 0x233   :  { %v159_v25 = vpop.f32.mrb[0].mxu0 }
 0x234   :  { %v160_v26 = vadd.f32 %v183_v24, %v159_v25  ;;  %v200_v27 = vpop.f32.mrb[1].mxu0 }
 0x236   :  { %164 = vst.msk [vmem:[#allocation7] sm:$0xff] %vm163_vm2, %v160_v26 }
 0x237   :  { %272 = shalt.err (!%p269_p6)
}
 0x238   :  { %s273_s26 = scalar_lea.hbm %s387_s5, 128 }
 0x239   :  { %p274_p7 = scmp.ne.s32.totalorder %s387_s5, %s273_s26  ;;  %p277_p8 = scmp.lt.u32.totalorder %s273_s26, %s387_s5 }
 0x23b   :  { %p279_p9 = pnand %p277_p8, %p274_p7 }
 0x23d   :  { %282 = shalt.err (!%p279_p9)
}
 0x23e   :  { %174 = dma.vmem_to_hbm [thread:$0]  %s172_s24, 128, %s387_s5, [#allocation4]  }
 0x23f   :  { %287 = dma.done.wait [#allocation4], 128  }
 0x240   :  { %288 = vsyncadd [#allocation4], 4294967168 }
 0x241   :  { %178 = vsyncpa [#allocation3], 1 }
 0x242   :  { %179 = vsyncpa [#allocation6], 1 }
 0x243   :  { %180 = vsyncpa [#allocation4], 1 }

</bundles_post_ra>
